<compile_context>
chip_gen: v7x
topology: tpu7x:2x2x1
jax: 0.10.0
libtpu: 0.0.40
codegen_flags: <defaults>
</compile_context>

<pallas_src>
import jax
import jax.numpy as jnp
from jax.experimental import pallas as pl
from jax.experimental.pallas import tpu as pltpu


def _vmem_spec():
    return pl.BlockSpec(memory_space=pltpu.MemorySpace.VMEM)


# ---------------------------------------------------------------------------
# Fused forward kernel: embeddings + num_layers MPGNN layers, h/e VMEM-resident.
# ---------------------------------------------------------------------------
def mpgnn_fused_kernel(
    h0_ref, e0_ref, idx_col_ref, rec_row_ref,
    embed_w_ref, embed_b_ref, edge_w_ref, edge_b_ref,
    wme1_ref, wme2_ref, wme3_ref, bme_ref,
    wh1_ref, wh2_ref, bh_ref,
    h_out_ref,
):
    num_nodes = h0_ref.shape[0]
    num_edges = e0_ref.shape[0]
    num_layers, hidden, _ = wh1_ref.shape

    # --- Node / edge embeddings (tiny fan-in; done in-kernel so h/e never leave VMEM).
    h = (
        jnp.dot(h0_ref[...], embed_w_ref[...], preferred_element_type=jnp.float32)
        + embed_b_ref[...]
    )  # [N, H]
    e = (
        jnp.dot(e0_ref[...], edge_w_ref[...], preferred_element_type=jnp.float32)
        + edge_b_ref[...]
    )  # [E, H]

    # --- One-hot gather / scatter matrices, built ONCE and reused by every layer.
    idx_col = idx_col_ref[...]  # [2E, 1] int32  (send ++ rec)
    rec_row = rec_row_ref[...]  # [1, E]  int32
    ids_g = jax.lax.broadcasted_iota(jnp.int32, (2 * num_edges, num_nodes), 1)
    ids_s = jax.lax.broadcasted_iota(jnp.int32, (num_nodes, num_edges), 0)
    oh_gather = (ids_g == idx_col).astype(jnp.float32)    # [2E, N]  row r picks h[idx[r]]
    oh_scatter = (ids_s == rec_row).astype(jnp.float32)   # [N, E]   scatter-add by rec

    # TODO(synk): for large N/E replace the one-hot matmul gather/scatter with a
    # scalar-prefetch (SMEM index table) + DMA-gather path and an edge-tiled grid.

    for l in range(num_layers):  # statically unrolled; num_layers is small
        # Both gathers via a single stacked MXU matmul, then sublane-slice.
        hg = jnp.dot(oh_gather, h, preferred_element_type=jnp.float32)  # [2E, H]
        h_send = hg[:num_edges]
        h_rec = hg[num_edges:]

        # Fused message_mlp + e_update (identical inputs, output-stacked [H, 2H]
        # weight blocks): 3 block matmuls -> [E, 2H] = (messages | e_new).
        me = (
            jnp.dot(h_send, wme1_ref[l], preferred_element_type=jnp.float32)
            + jnp.dot(h_rec, wme2_ref[l], preferred_element_type=jnp.float32)
            + jnp.dot(e, wme3_ref[l], preferred_element_type=jnp.float32)
            + bme_ref[l]
        )
        messages = me[:, :hidden]
        e_new = me[:, hidden:]

        # messages_agg = scatter_add(messages, rec, dim_size=N)  (exact 0/1 matmul).
        msg_agg = jnp.dot(oh_scatter, messages, preferred_element_type=jnp.float32)

        # h_new = h_update(cat(h, messages_agg))  (weight split along fan-in).
        h = (
            jnp.dot(h, wh1_ref[l], preferred_element_type=jnp.float32)
            + jnp.dot(msg_agg, wh2_ref[l], preferred_element_type=jnp.float32)
            + bh_ref[l]
        )
        e = e_new

    h_out_ref[...] = h.astype(h_out_ref.dtype)


def mpgnn_forward(params, h0, e0, edge_index):
    send = edge_index[0].astype(jnp.int32)
    rec = edge_index[1].astype(jnp.int32)
    idx_col = jnp.concatenate([send, rec]).reshape(-1, 1)  # [2E, 1]
    rec_row = rec.reshape(1, -1)                           # [1, E]

    layers = params["layers"]
    # Stack per-layer weights along a leading layer axis; fuse message/e_update
    # weights along the output dim -> [H, 2H] blocks per fan-in piece.
    wme1 = jnp.stack([jnp.concatenate([p["wm1"], p["we1"]], axis=1) for p in layers])
    wme2 = jnp.stack([jnp.concatenate([p["wm2"], p["we2"]], axis=1) for p in layers])
    wme3 = jnp.stack([jnp.concatenate([p["wm3"], p["we3"]], axis=1) for p in layers])
    bme = jnp.stack([jnp.concatenate([p["bm"], p["be"]], axis=1) for p in layers])
    wh1 = jnp.stack([p["wh1"] for p in layers])
    wh2 = jnp.stack([p["wh2"] for p in layers])
    bh = jnp.stack([p["bh"] for p in layers])

    num_nodes = h0.shape[0]
    hidden = params["embed_w"].shape[1]

    ins = (
        h0, e0, idx_col, rec_row,
        params["embed_w"], params["embed_b"], params["edge_w"], params["edge_b"],
        wme1, wme2, wme3, bme, wh1, wh2, bh,
    )
    return pl.pallas_call(
        mpgnn_fused_kernel,
        out_shape=jax.ShapeDtypeStruct((num_nodes, hidden), jnp.float32),
        in_specs=[_vmem_spec()] * len(ins),
        out_specs=_vmem_spec(),
        compiler_params=pltpu.CompilerParams(vmem_limit_bytes=32 * 1024 * 1024),
    )(*ins)


# ---------------------------------------------------------------------------
# Parameter construction (deterministic, mimics nn.Linear default init)
# ---------------------------------------------------------------------------
def _linear_params(key, fan_in, fan_out):
    kw, kb = jax.random.split(key)
    bound = 1.0 / (fan_in ** 0.5)
    w = jax.random.uniform(kw, (fan_in, fan_out), jnp.float32, -bound, bound)
    b = jax.random.uniform(kb, (1, fan_out), jnp.float32, -bound, bound)
    return w, b


def _layer_params(key, hidden):
    k1, k2, k3 = jax.random.split(key, 3)
    wm, bm = _linear_params(k1, 3 * hidden, hidden)   # message_mlp
    wh, bh = _linear_params(k2, 2 * hidden, hidden)   # h_update
    we, be = _linear_params(k3, 3 * hidden, hidden)   # e_update
    wm1, wm2, wm3 = jnp.split(wm, 3, axis=0)
    wh1, wh2 = jnp.split(wh, 2, axis=0)
    we1, we2, we3 = jnp.split(we, 3, axis=0)
    return dict(
        wm1=wm1, wm2=wm2, wm3=wm3, bm=bm,
        wh1=wh1, wh2=wh2, bh=bh,
        we1=we1, we2=we2, we3=we3, be=be,
    )


def init_mpgnn_params(key, feat_in, edge_feat_in, num_hidden, num_layers):
    keys = jax.random.split(key, num_layers + 2)
    embed_w, embed_b = _linear_params(keys[0], feat_in, num_hidden)
    edge_w, edge_b = _linear_params(keys[1], edge_feat_in, num_hidden)
    layers = [_layer_params(keys[2 + i], num_hidden) for i in range(num_layers)]
    return dict(embed_w=embed_w, embed_b=embed_b,
                edge_w=edge_w, edge_b=edge_b, layers=layers)


# ---------------------------------------------------------------------------
# Pure-JAX reference (unfused, matches the PyTorch module math)
# ---------------------------------------------------------------------------
def mpgnn_reference(params, h, e, edge_index):
    send, rec = edge_index[0], edge_index[1]
    h = h @ params["embed_w"] + params["embed_b"][0]
    e = e @ params["edge_w"] + params["edge_b"][0]
    for p in params["layers"]:
        h_send, h_rec = h[send], h[rec]
        wm = jnp.concatenate([p["wm1"], p["wm2"], p["wm3"]], axis=0)
        messages = jnp.concatenate([h_send, h_rec, e], axis=1) @ wm + p["bm"][0]
        msg_agg = jnp.zeros_like(h).at[rec].add(messages)
        wh = jnp.concatenate([p["wh1"], p["wh2"]], axis=0)
        h_new = jnp.concatenate([h, msg_agg], axis=1) @ wh + p["bh"][0]
        we = jnp.concatenate([p["we1"], p["we2"], p["we3"]], axis=0)
        e = jnp.concatenate([h_send, h_rec, e], axis=1) @ we + p["be"][0]
        h = h_new
    return h


# ---------------------------------------------------------------------------
if __name__ == "__main__":
    FEAT_IN = 6
    EDGE_FEAT_IN = 3
    NUM_HIDDEN = 32
    NUM_LAYERS = 2
    NUM_NODES = 8
    NUM_EDGES = 16

    key = jax.random.PRNGKey(0)
    k_h, k_e, k_send, k_rec, k_params = jax.random.split(key, 5)

    h_in = jax.random.normal(k_h, (NUM_NODES, FEAT_IN), jnp.float32)
    e_in = jax.random.normal(k_e, (NUM_EDGES, EDGE_FEAT_IN), jnp.float32)
    send = jax.random.randint(k_send, (NUM_EDGES,), 0, NUM_NODES, jnp.int32)
    rec = jax.random.randint(k_rec, (NUM_EDGES,), 0, NUM_NODES, jnp.int32)
    edge_index = jnp.stack([send, rec], axis=0)   # [2, E]

    params = init_mpgnn_params(k_params, FEAT_IN, EDGE_FEAT_IN,
                               NUM_HIDDEN, NUM_LAYERS)

    out = mpgnn_forward(params, h_in, e_in, edge_index)
    out = jax.block_until_ready(out)

    ref = mpgnn_reference(params, h_in, e_in, edge_index)
    assert out.shape == (NUM_NODES, NUM_HIDDEN)
    assert jnp.allclose(out, ref, rtol=1e-3, atol=1e-3), (
        f"max abs err {jnp.max(jnp.abs(out - ref))}")

    print("KERNEL_OK")
</pallas_src>

<mosaic_0001>
module attributes {stable_mosaic.version = 11 : i64} {
  func.func @mpgnn_fused_kernel(%arg0: memref<8x6xf32, #tpu.memory_space<vmem>>, %arg1: memref<16x3xf32, #tpu.memory_space<vmem>>, %arg2: memref<32x1xi32, #tpu.memory_space<vmem>>, %arg3: memref<1x16xi32, #tpu.memory_space<vmem>>, %arg4: memref<6x32xf32, #tpu.memory_space<vmem>>, %arg5: memref<1x32xf32, #tpu.memory_space<vmem>>, %arg6: memref<3x32xf32, #tpu.memory_space<vmem>>, %arg7: memref<1x32xf32, #tpu.memory_space<vmem>>, %arg8: memref<2x32x64xf32, #tpu.memory_space<vmem>>, %arg9: memref<2x32x64xf32, #tpu.memory_space<vmem>>, %arg10: memref<2x32x64xf32, #tpu.memory_space<vmem>>, %arg11: memref<2x1x64xf32, #tpu.memory_space<vmem>>, %arg12: memref<2x32x32xf32, #tpu.memory_space<vmem>>, %arg13: memref<2x32x32xf32, #tpu.memory_space<vmem>>, %arg14: memref<2x1x32xf32, #tpu.memory_space<vmem>>, %arg15: memref<8x32xf32, #tpu.memory_space<vmem>>) attributes {dimension_semantics = [], scalar_prefetch = 0 : i64, scratch_operands = 0 : i64, tpu.core_type = #tpu.core_type<tc>} {
    %c0 = arith.constant 0 : index
    %c0_0 = arith.constant 0 : index
    %0 = vector.load %arg0[%c0, %c0_0] : memref<8x6xf32, #tpu.memory_space<vmem>>, vector<8x6xf32>
    %c0_1 = arith.constant 0 : index
    %c0_2 = arith.constant 0 : index
    %1 = vector.load %arg4[%c0_1, %c0_2] : memref<6x32xf32, #tpu.memory_space<vmem>>, vector<6x32xf32>
    %cst = arith.constant dense<0.000000e+00> : vector<8x32xf32>
    %2 = tpu.matmul %0, %1, %cst {dimension_numbers = #tpu.dot_dimension_numbers<[1], [0], [0], [1], [0, 0, 1, 1], [], []>} : vector<8x6xf32>, vector<6x32xf32>, vector<8x32xf32> -> vector<8x32xf32>
    %c0_3 = arith.constant 0 : index
    %c0_4 = arith.constant 0 : index
    %3 = vector.load %arg5[%c0_3, %c0_4] : memref<1x32xf32, #tpu.memory_space<vmem>>, vector<1x32xf32>
    %4 = vector.broadcast %3 : vector<1x32xf32> to vector<8x32xf32>
    %5 = arith.addf %2, %4 : vector<8x32xf32>
    %c0_5 = arith.constant 0 : index
    %c0_6 = arith.constant 0 : index
    %6 = vector.load %arg1[%c0_5, %c0_6] : memref<16x3xf32, #tpu.memory_space<vmem>>, vector<16x3xf32>
    %c0_7 = arith.constant 0 : index
    %c0_8 = arith.constant 0 : index
    %7 = vector.load %arg6[%c0_7, %c0_8] : memref<3x32xf32, #tpu.memory_space<vmem>>, vector<3x32xf32>
    %cst_9 = arith.constant dense<0.000000e+00> : vector<16x32xf32>
    %8 = tpu.matmul %6, %7, %cst_9 {dimension_numbers = #tpu.dot_dimension_numbers<[1], [0], [0], [1], [0, 0, 1, 1], [], []>} : vector<16x3xf32>, vector<3x32xf32>, vector<16x32xf32> -> vector<16x32xf32>
    %c0_10 = arith.constant 0 : index
    %c0_11 = arith.constant 0 : index
    %9 = vector.load %arg7[%c0_10, %c0_11] : memref<1x32xf32, #tpu.memory_space<vmem>>, vector<1x32xf32>
    %10 = vector.broadcast %9 : vector<1x32xf32> to vector<16x32xf32>
    %11 = arith.addf %8, %10 : vector<16x32xf32>
    %c0_12 = arith.constant 0 : index
    %c0_13 = arith.constant 0 : index
    %12 = vector.load %arg2[%c0_12, %c0_13] : memref<32x1xi32, #tpu.memory_space<vmem>>, vector<32x1xi32>
    %c0_14 = arith.constant 0 : index
    %c0_15 = arith.constant 0 : index
    %13 = vector.load %arg3[%c0_14, %c0_15] : memref<1x16xi32, #tpu.memory_space<vmem>>, vector<1x16xi32>
    %14 = tpu.iota {dimensions = array<i32: 1>} : vector<32x8xi32>
    %15 = tpu.iota {dimensions = array<i32: 0>} : vector<8x16xi32>
    %16 = vector.broadcast %12 : vector<32x1xi32> to vector<32x8xi32>
    %17 = arith.cmpi eq, %14, %16 : vector<32x8xi32>
    %18 = arith.extui %17 : vector<32x8xi1> to vector<32x8xi32>
    %19 = arith.sitofp %18 : vector<32x8xi32> to vector<32x8xf32>
    %20 = vector.broadcast %13 : vector<1x16xi32> to vector<8x16xi32>
    %21 = arith.cmpi eq, %15, %20 : vector<8x16xi32>
    %22 = arith.extui %21 : vector<8x16xi1> to vector<8x16xi32>
    %23 = arith.sitofp %22 : vector<8x16xi32> to vector<8x16xf32>
    %cst_16 = arith.constant dense<0.000000e+00> : vector<32x32xf32>
    %24 = tpu.matmul %19, %5, %cst_16 {dimension_numbers = #tpu.dot_dimension_numbers<[1], [0], [0], [1], [0, 0, 1, 1], [], []>} : vector<32x8xf32>, vector<8x32xf32>, vector<32x32xf32> -> vector<32x32xf32>
    %25 = vector.extract_strided_slice %24 {offsets = [0, 0], sizes = [16, 32], strides = [1, 1]} : vector<32x32xf32> to vector<16x32xf32>
    %26 = vector.extract_strided_slice %24 {offsets = [16, 0], sizes = [16, 32], strides = [1, 1]} : vector<32x32xf32> to vector<16x32xf32>
    %c0_17 = arith.constant 0 : index
    %c0_18 = arith.constant 0 : index
    %c0_19 = arith.constant 0 : index
    %27 = vector.load %arg8[%c0_17, %c0_18, %c0_19] : memref<2x32x64xf32, #tpu.memory_space<vmem>>, vector<1x32x64xf32>
    %28 = vector.shape_cast %27 : vector<1x32x64xf32> to vector<32x64xf32>
    %cst_20 = arith.constant dense<0.000000e+00> : vector<16x64xf32>
    %29 = tpu.matmul %25, %28, %cst_20 {dimension_numbers = #tpu.dot_dimension_numbers<[1], [0], [0], [1], [0, 0, 1, 1], [], []>} : vector<16x32xf32>, vector<32x64xf32>, vector<16x64xf32> -> vector<16x64xf32>
    %c0_21 = arith.constant 0 : index
    %c0_22 = arith.constant 0 : index
    %c0_23 = arith.constant 0 : index
    %30 = vector.load %arg9[%c0_21, %c0_22, %c0_23] : memref<2x32x64xf32, #tpu.memory_space<vmem>>, vector<1x32x64xf32>
    %31 = vector.shape_cast %30 : vector<1x32x64xf32> to vector<32x64xf32>
    %cst_24 = arith.constant dense<0.000000e+00> : vector<16x64xf32>
    %32 = tpu.matmul %26, %31, %cst_24 {dimension_numbers = #tpu.dot_dimension_numbers<[1], [0], [0], [1], [0, 0, 1, 1], [], []>} : vector<16x32xf32>, vector<32x64xf32>, vector<16x64xf32> -> vector<16x64xf32>
    %33 = arith.addf %29, %32 : vector<16x64xf32>
    %c0_25 = arith.constant 0 : index
    %c0_26 = arith.constant 0 : index
    %c0_27 = arith.constant 0 : index
    %34 = vector.load %arg10[%c0_25, %c0_26, %c0_27] : memref<2x32x64xf32, #tpu.memory_space<vmem>>, vector<1x32x64xf32>
    %35 = vector.shape_cast %34 : vector<1x32x64xf32> to vector<32x64xf32>
    %cst_28 = arith.constant dense<0.000000e+00> : vector<16x64xf32>
    %36 = tpu.matmul %11, %35, %cst_28 {dimension_numbers = #tpu.dot_dimension_numbers<[1], [0], [0], [1], [0, 0, 1, 1], [], []>} : vector<16x32xf32>, vector<32x64xf32>, vector<16x64xf32> -> vector<16x64xf32>
    %37 = arith.addf %33, %36 : vector<16x64xf32>
    %c0_29 = arith.constant 0 : index
    %c0_30 = arith.constant 0 : index
    %c0_31 = arith.constant 0 : index
    %38 = vector.load %arg11[%c0_29, %c0_30, %c0_31] : memref<2x1x64xf32, #tpu.memory_space<vmem>>, vector<1x1x64xf32>
    %39 = vector.shape_cast %38 : vector<1x1x64xf32> to vector<1x64xf32>
    %40 = vector.broadcast %39 : vector<1x64xf32> to vector<16x64xf32>
    %41 = arith.addf %37, %40 : vector<16x64xf32>
    %42 = vector.extract_strided_slice %41 {offsets = [0, 0], sizes = [16, 32], strides = [1, 1]} : vector<16x64xf32> to vector<16x32xf32>
    %43 = vector.extract_strided_slice %41 {offsets = [0, 32], sizes = [16, 32], strides = [1, 1]} : vector<16x64xf32> to vector<16x32xf32>
    %cst_32 = arith.constant dense<0.000000e+00> : vector<8x32xf32>
    %44 = tpu.matmul %23, %42, %cst_32 {dimension_numbers = #tpu.dot_dimension_numbers<[1], [0], [0], [1], [0, 0, 1, 1], [], []>} : vector<8x16xf32>, vector<16x32xf32>, vector<8x32xf32> -> vector<8x32xf32>
    %c0_33 = arith.constant 0 : index
    %c0_34 = arith.constant 0 : index
    %c0_35 = arith.constant 0 : index
    %45 = vector.load %arg12[%c0_33, %c0_34, %c0_35] : memref<2x32x32xf32, #tpu.memory_space<vmem>>, vector<1x32x32xf32>
    %46 = vector.shape_cast %45 : vector<1x32x32xf32> to vector<32x32xf32>
    %cst_36 = arith.constant dense<0.000000e+00> : vector<8x32xf32>
    %47 = tpu.matmul %5, %46, %cst_36 {dimension_numbers = #tpu.dot_dimension_numbers<[1], [0], [0], [1], [0, 0, 1, 1], [], []>} : vector<8x32xf32>, vector<32x32xf32>, vector<8x32xf32> -> vector<8x32xf32>
    %c0_37 = arith.constant 0 : index
    %c0_38 = arith.constant 0 : index
    %c0_39 = arith.constant 0 : index
    %48 = vector.load %arg13[%c0_37, %c0_38, %c0_39] : memref<2x32x32xf32, #tpu.memory_space<vmem>>, vector<1x32x32xf32>
    %49 = vector.shape_cast %48 : vector<1x32x32xf32> to vector<32x32xf32>
    %cst_40 = arith.constant dense<0.000000e+00> : vector<8x32xf32>
    %50 = tpu.matmul %44, %49, %cst_40 {dimension_numbers = #tpu.dot_dimension_numbers<[1], [0], [0], [1], [0, 0, 1, 1], [], []>} : vector<8x32xf32>, vector<32x32xf32>, vector<8x32xf32> -> vector<8x32xf32>
    %51 = arith.addf %47, %50 : vector<8x32xf32>
    %c0_41 = arith.constant 0 : index
    %c0_42 = arith.constant 0 : index
    %c0_43 = arith.constant 0 : index
    %52 = vector.load %arg14[%c0_41, %c0_42, %c0_43] : memref<2x1x32xf32, #tpu.memory_space<vmem>>, vector<1x1x32xf32>
    %53 = vector.shape_cast %52 : vector<1x1x32xf32> to vector<1x32xf32>
    %54 = vector.broadcast %53 : vector<1x32xf32> to vector<8x32xf32>
    %55 = arith.addf %51, %54 : vector<8x32xf32>
    %cst_44 = arith.constant dense<0.000000e+00> : vector<32x32xf32>
    %56 = tpu.matmul %19, %55, %cst_44 {dimension_numbers = #tpu.dot_dimension_numbers<[1], [0], [0], [1], [0, 0, 1, 1], [], []>} : vector<32x8xf32>, vector<8x32xf32>, vector<32x32xf32> -> vector<32x32xf32>
    %57 = vector.extract_strided_slice %56 {offsets = [0, 0], sizes = [16, 32], strides = [1, 1]} : vector<32x32xf32> to vector<16x32xf32>
    %58 = vector.extract_strided_slice %56 {offsets = [16, 0], sizes = [16, 32], strides = [1, 1]} : vector<32x32xf32> to vector<16x32xf32>
    %c1 = arith.constant 1 : index
    %c0_45 = arith.constant 0 : index
    %c0_46 = arith.constant 0 : index
    %59 = vector.load %arg8[%c1, %c0_45, %c0_46] : memref<2x32x64xf32, #tpu.memory_space<vmem>>, vector<1x32x64xf32>
    %60 = vector.shape_cast %59 : vector<1x32x64xf32> to vector<32x64xf32>
    %cst_47 = arith.constant dense<0.000000e+00> : vector<16x64xf32>
    %61 = tpu.matmul %57, %60, %cst_47 {dimension_numbers = #tpu.dot_dimension_numbers<[1], [0], [0], [1], [0, 0, 1, 1], [], []>} : vector<16x32xf32>, vector<32x64xf32>, vector<16x64xf32> -> vector<16x64xf32>
    %c1_48 = arith.constant 1 : index
    %c0_49 = arith.constant 0 : index
    %c0_50 = arith.constant 0 : index
    %62 = vector.load %arg9[%c1_48, %c0_49, %c0_50] : memref<2x32x64xf32, #tpu.memory_space<vmem>>, vector<1x32x64xf32>
    %63 = vector.shape_cast %62 : vector<1x32x64xf32> to vector<32x64xf32>
    %cst_51 = arith.constant dense<0.000000e+00> : vector<16x64xf32>
    %64 = tpu.matmul %58, %63, %cst_51 {dimension_numbers = #tpu.dot_dimension_numbers<[1], [0], [0], [1], [0, 0, 1, 1], [], []>} : vector<16x32xf32>, vector<32x64xf32>, vector<16x64xf32> -> vector<16x64xf32>
    %65 = arith.addf %61, %64 : vector<16x64xf32>
    %c1_52 = arith.constant 1 : index
    %c0_53 = arith.constant 0 : index
    %c0_54 = arith.constant 0 : index
    %66 = vector.load %arg10[%c1_52, %c0_53, %c0_54] : memref<2x32x64xf32, #tpu.memory_space<vmem>>, vector<1x32x64xf32>
    %67 = vector.shape_cast %66 : vector<1x32x64xf32> to vector<32x64xf32>
    %cst_55 = arith.constant dense<0.000000e+00> : vector<16x64xf32>
    %68 = tpu.matmul %43, %67, %cst_55 {dimension_numbers = #tpu.dot_dimension_numbers<[1], [0], [0], [1], [0, 0, 1, 1], [], []>} : vector<16x32xf32>, vector<32x64xf32>, vector<16x64xf32> -> vector<16x64xf32>
    %69 = arith.addf %65, %68 : vector<16x64xf32>
    %c1_56 = arith.constant 1 : index
    %c0_57 = arith.constant 0 : index
    %c0_58 = arith.constant 0 : index
    %70 = vector.load %arg11[%c1_56, %c0_57, %c0_58] : memref<2x1x64xf32, #tpu.memory_space<vmem>>, vector<1x1x64xf32>
    %71 = vector.shape_cast %70 : vector<1x1x64xf32> to vector<1x64xf32>
    %72 = vector.broadcast %71 : vector<1x64xf32> to vector<16x64xf32>
    %73 = arith.addf %69, %72 : vector<16x64xf32>
    %74 = vector.extract_strided_slice %73 {offsets = [0, 0], sizes = [16, 32], strides = [1, 1]} : vector<16x64xf32> to vector<16x32xf32>
    %cst_59 = arith.constant dense<0.000000e+00> : vector<8x32xf32>
    %75 = tpu.matmul %23, %74, %cst_59 {dimension_numbers = #tpu.dot_dimension_numbers<[1], [0], [0], [1], [0, 0, 1, 1], [], []>} : vector<8x16xf32>, vector<16x32xf32>, vector<8x32xf32> -> vector<8x32xf32>
    %c1_60 = arith.constant 1 : index
    %c0_61 = arith.constant 0 : index
    %c0_62 = arith.constant 0 : index
    %76 = vector.load %arg12[%c1_60, %c0_61, %c0_62] : memref<2x32x32xf32, #tpu.memory_space<vmem>>, vector<1x32x32xf32>
    %77 = vector.shape_cast %76 : vector<1x32x32xf32> to vector<32x32xf32>
    %cst_63 = arith.constant dense<0.000000e+00> : vector<8x32xf32>
    %78 = tpu.matmul %55, %77, %cst_63 {dimension_numbers = #tpu.dot_dimension_numbers<[1], [0], [0], [1], [0, 0, 1, 1], [], []>} : vector<8x32xf32>, vector<32x32xf32>, vector<8x32xf32> -> vector<8x32xf32>
    %c1_64 = arith.constant 1 : index
    %c0_65 = arith.constant 0 : index
    %c0_66 = arith.constant 0 : index
    %79 = vector.load %arg13[%c1_64, %c0_65, %c0_66] : memref<2x32x32xf32, #tpu.memory_space<vmem>>, vector<1x32x32xf32>
    %80 = vector.shape_cast %79 : vector<1x32x32xf32> to vector<32x32xf32>
    %cst_67 = arith.constant dense<0.000000e+00> : vector<8x32xf32>
    %81 = tpu.matmul %75, %80, %cst_67 {dimension_numbers = #tpu.dot_dimension_numbers<[1], [0], [0], [1], [0, 0, 1, 1], [], []>} : vector<8x32xf32>, vector<32x32xf32>, vector<8x32xf32> -> vector<8x32xf32>
    %82 = arith.addf %78, %81 : vector<8x32xf32>
    %c1_68 = arith.constant 1 : index
    %c0_69 = arith.constant 0 : index
    %c0_70 = arith.constant 0 : index
    %83 = vector.load %arg14[%c1_68, %c0_69, %c0_70] : memref<2x1x32xf32, #tpu.memory_space<vmem>>, vector<1x1x32xf32>
    %84 = vector.shape_cast %83 : vector<1x1x32xf32> to vector<1x32xf32>
    %85 = vector.broadcast %84 : vector<1x32xf32> to vector<8x32xf32>
    %86 = arith.addf %82, %85 : vector<8x32xf32>
    %c0_71 = arith.constant 0 : index
    %c0_72 = arith.constant 0 : index
    %87 = vector.load %arg15[%c0_71, %c0_72] : memref<8x32xf32, #tpu.memory_space<vmem>>, vector<8x32xf32>
    tpu.vector_store %arg15[%c0_71, %c0_72], %86 {strides = array<i32>} : memref<8x32xf32, #tpu.memory_space<vmem>>, vector<8x32xf32>,
    return
  }
}

</mosaic_0001>

<bundles_post_ra>
// kernel: tpu_custom_call.1
= control target key start
LH: loop header
LB: loop body
LE: loop exit
PB: predicated region body
PF: predicated region fallthrough
CT: control target
= control target key end

     0   :  { %20 = vsyncpa [#allocation3], 0  ;;  %s2507_s0 = inlined_call_operand.vmem [shape: f32[8,6], index: 0, kind: input, shape index: {}]   ;;  %s2508_s1 = inlined_call_operand.vmem [shape: f32[16,3], index: 1, kind: input, shape index: {}]   ;;  %s2509_s2 = inlined_call_operand.vmem [shape: s32[32,1], index: 2, kind: input, shape index: {}]   ;;  %s2510_s3 = inlined_call_operand.vmem [shape: s32[1,16], index: 3, kind: input, shape index: {}]   ;;  %s2511_s4 = inlined_call_operand.vmem [shape: f32[6,32], index: 4, kind: input, shape index: {}]   ;;  %s2512_s5 = inlined_call_operand.hbm [shape: f32[1,32], index: 5, kind: input, shape index: {}]   ;;  %s2513_s6 = inlined_call_operand.hbm [shape: f32[3,32], index: 6, kind: input, shape index: {}]   ;;  %s2514_s7 = inlined_call_operand.hbm [shape: f32[1,32], index: 7, kind: input, shape index: {}]   ;;  %s2515_s8 = inlined_call_operand.vmem [shape: f32[2,32,64], index: 8, kind: input, shape index: {}]   ;;  %s2516_s9 = inlined_call_operand.hbm [shape: f32[2,32,64], index: 9, kind: input, shape index: {}]   ;;  %s2517_s10 = inlined_call_operand.hbm [shape: f32[2,32,64], index: 10, kind: input, shape index: {}]   ;;  %s2518_s11 = inlined_call_operand.vmem [shape: f32[2,1,64], index: 11, kind: input, shape index: {}]   ;;  %s2519_s12 = inlined_call_operand.hbm [shape: f32[2,32,32], index: 12, kind: input, shape index: {}]   ;;  %s2520_s13 = inlined_call_operand.hbm [shape: f32[2,32,32], index: 13, kind: input, shape index: {}]   ;;  %s2521_s14 = inlined_call_operand.vmem [shape: f32[2,1,32], index: 14, kind: input, shape index: {}]   ;;  %s2522_s15 = inlined_call_operand.hbm [shape: f32[8,32], index: 15, kind: output, shape index: {}]  }
   0x1   :  { %21 = vsyncpa [#allocation6], 0 }
   0x2   :  { %22 = vsyncpa [#allocation9], 0 }
   0x3   :  { %23 = vsyncpa [#allocation12], 0 }
   0x4   :  { %24 = vsyncpa [#allocation4], 0  ;;  %s2142_s18 = smov [#allocation5]   ;;  %s2143_s20 = smov [#allocation8]  }
   0x5   :  { %s51_s19 = sshll.u32 %s2142_s18, 4  ;;  %s72_s21 = sshll.u32 %s2143_s20, 4  ;;  %s52_s19 = int_to_ptr.vmem [resolvable:$true] %s51_s19  ;;  %s2237_s21 = int_to_ptr.vmem [resolvable:$true] %s72_s21 }
   0x6   :  { %s1956_s24 = scalar_lea.hbm %s2513_s6, 64 }
   0x7   :  { %p1957_p0 = scmp.ne.s32.totalorder %s2513_s6, %s1956_s24  ;;  %p1960_p1 = scmp.lt.u32.totalorder %s1956_s24, %s2513_s6 }
   0x9   :  { %p1962_p2 = pnand %p1960_p1, %p1957_p0 }
   0xb   :  { %1965 = shalt.err (!%p1962_p2)
}
   0xc   :  { %s1966_s29 = scalar_lea.vmem %s52_s19, 64  ;;  %p1971_p4 = scmp.lt.s32.totalorder %s52_s19, %s52_s19 }
   0xd   :  { %p1967_p3 = scmp.ne.s32.totalorder %s52_s19, %s1966_s29  ;;  %p1972_p5 = scmp.lt.s32.totalorder %s1966_s29, %s1966_s29 }
   0xf   :  { %p1973_p6 = por %p1972_p5, %p1971_p4 }
  0x11   :  { %p1974_p7 = pnand %p1973_p6, %p1967_p3 }
  0x13   :  { %1977 = shalt.err (!%p1974_p7)
}
  0x14   :  { %54 = dma.hbm_to_vmem [thread:$0]  %s2513_s6, 64, %s52_s19, [#allocation6]  }
  0x15   :  { %s1978_s20 = scalar_lea.hbm %s2516_s9, 1024 }
  0x16   :  { %p1979_p8 = scmp.ne.s32.totalorder %s2516_s9, %s1978_s20  ;;  %p1982_p9 = scmp.lt.u32.totalorder %s1978_s20, %s2516_s9 }
  0x18   :  { %p1984_p10 = pnand %p1982_p9, %p1979_p8 }
  0x1a   :  { %1987 = shalt.err (!%p1984_p10)
}
  0x1b   :  { %s1988_s26 = scalar_lea.vmem %s2237_s21, 1024  ;;  %p1993_p12 = scmp.lt.s32.totalorder %s2237_s21, %s2237_s21 }
  0x1c   :  { %p1989_p11 = scmp.ne.s32.totalorder %s2237_s21, %s1988_s26  ;;  %p1994_p13 = scmp.lt.s32.totalorder %s1988_s26, %s1988_s26 }
  0x1e   :  { %p1995_p0 = por %p1994_p13, %p1993_p12 }
  0x20   :  { %p1996_p1 = pnand %p1995_p0, %p1989_p11 }
  0x22   :  { %1999 = shalt.err (!%p1996_p1)
}
  0x23   :  { %s2144_s6 = smov 128   ;;  %s2145_s19 = smov 8  }
  0x24   :  { %78 = dma.hbm_to_vmem [thread:$0]  %s2516_s9, 1024, %s2237_s21, [#allocation9], %s2144_s6, %s2144_s6, %s2145_s19  }
  0x25   :  { %s2146_s29 = smov [#allocation11]   ;;  %s2147_s16 = smov [#allocation2]  }
  0x26   :  { %s98_s30 = sshll.u32 %s2146_s29, 4  ;;  %s41_s17 = sshll.u32 %s2147_s16, 4  ;;  %s99_s30 = int_to_ptr.vmem [resolvable:$true] %s98_s30  ;;  %s42_s17 = int_to_ptr.vmem [resolvable:$true] %s41_s17 }
  0x27   :  { %s2000_s22 = scalar_lea.hbm %s2519_s12, 1024 }
  0x28   :  { %p2001_p2 = scmp.ne.s32.totalorder %s2519_s12, %s2000_s22  ;;  %p2004_p3 = scmp.lt.u32.totalorder %s2000_s22, %s2519_s12 }
  0x2a   :  { %p2006_p4 = pnand %p2004_p3, %p2001_p2 }
  0x2c   :  { %2009 = shalt.err (!%p2006_p4)
}
  0x2d   :  { %s2010_s9 = scalar_lea.vmem %s99_s30, 1024  ;;  %p2015_p6 = scmp.lt.s32.totalorder %s99_s30, %s99_s30 }
  0x2e   :  { %p2011_p5 = scmp.ne.s32.totalorder %s99_s30, %s2010_s9  ;;  %p2016_p7 = scmp.lt.s32.totalorder %s2010_s9, %s2010_s9 }
  0x30   :  { %p2017_p8 = por %p2016_p7, %p2015_p6 }
  0x32   :  { %p2018_p9 = pnand %p2017_p8, %p2011_p5 }
  0x34   :  { %2021 = shalt.err (!%p2018_p9)
}
  0x35   :  { %104 = dma.hbm_to_vmem [thread:$0]  %s2519_s12, 1024, %s99_s30, [#allocation12], %s2144_s6, %s2144_s6, %s2145_s19  }
  0x36   :  { %s2022_s16 = scalar_lea.hbm %s2512_s5, 16 }
  0x37   :  { %p2023_p10 = scmp.ne.s32.totalorder %s2512_s5, %s2022_s16  ;;  %p2026_p11 = scmp.lt.u32.totalorder %s2022_s16, %s2512_s5 }
  0x39   :  { %p2028_p12 = pnand %p2026_p11, %p2023_p10 }
  0x3b   :  { %2031 = shalt.err (!%p2028_p12)
}
  0x3c   :  { %s2032_s24 = scalar_lea.vmem %s42_s17, 16  ;;  %s2036_s25 = scalar_lea.vmem %s42_s17, 32 }
  0x3d   :  { %p2033_p13 = scmp.ne.s32.totalorder %s42_s17, %s2032_s24  ;;  %p2037_p0 = scmp.lt.s32.totalorder %s42_s17, %s42_s17 }
  0x3e   :  { %p2038_p1 = scmp.lt.s32.totalorder %s2036_s25, %s2032_s24 }
  0x40   :  { %p2039_p2 = por %p2038_p1, %p2037_p0 }
  0x42   :  { %p2040_p3 = pnand %p2039_p2, %p2033_p13 }
  0x44   :  { %2043 = shalt.err (!%p2040_p3)
}
  0x45   :  { %44 = dma.hbm_to_vmem [thread:$0]  %s2512_s5, 16, %s42_s17, [#allocation3]  }
  0x46   :  { %s2148_s26 = smov [#allocation7]   ;;  %s2149_s21 = smov [#allocation10]  }
  0x47   :  { %s61_s9 = sshll.u32 %s2148_s26, 4  ;;  %s84_s27 = sshll.u32 %s2149_s21, 4  ;;  %s62_s9 = int_to_ptr.vmem [resolvable:$true] %s61_s9  ;;  %s2298_s27 = int_to_ptr.vmem [resolvable:$true] %s84_s27 }
  0x48   :  { %s2044_s16 = scalar_lea.hbm %s2514_s7, 16 }
  0x49   :  { %p2045_p4 = scmp.ne.s32.totalorder %s2514_s7, %s2044_s16  ;;  %p2048_p5 = scmp.lt.u32.totalorder %s2044_s16, %s2514_s7 }
  0x4b   :  { %p2050_p6 = pnand %p2048_p5, %p2045_p4 }
  0x4d   :  { %2053 = shalt.err (!%p2050_p6)
}
  0x4e   :  { %s2054_s5 = scalar_lea.vmem %s62_s9, 16  ;;  %s2058_s17 = scalar_lea.vmem %s62_s9, 32 }
  0x4f   :  { %p2055_p7 = scmp.ne.s32.totalorder %s62_s9, %s2054_s5  ;;  %p2059_p8 = scmp.lt.s32.totalorder %s62_s9, %s62_s9 }
  0x50   :  { %p2060_p9 = scmp.lt.s32.totalorder %s2058_s17, %s2054_s5 }
  0x52   :  { %p2061_p10 = por %p2060_p9, %p2059_p8 }
  0x54   :  { %p2062_p11 = pnand %p2061_p10, %p2055_p7 }
  0x56   :  { %2065 = shalt.err (!%p2062_p11)
}
  0x57   :  { %64 = dma.hbm_to_vmem [thread:$0]  %s2514_s7, 16, %s62_s9, [#allocation6]  }
  0x58   :  { %s2066_s26 = scalar_lea.hbm %s2517_s10, 1024 }
  0x59   :  { %p2067_p12 = scmp.ne.s32.totalorder %s2517_s10, %s2066_s26  ;;  %p2070_p13 = scmp.lt.u32.totalorder %s2066_s26, %s2517_s10 }
  0x5b   :  { %p2072_p0 = pnand %p2070_p13, %p2067_p12 }
  0x5d   :  { %2075 = shalt.err (!%p2072_p0)
}
  0x5e   :  { %s2076_s18 = scalar_lea.vmem %s2298_s27, 1024  ;;  %p2081_p2 = scmp.lt.s32.totalorder %s2298_s27, %s2298_s27 }
  0x5f   :  { %p2077_p1 = scmp.ne.s32.totalorder %s2298_s27, %s2076_s18  ;;  %p2082_p3 = scmp.lt.s32.totalorder %s2076_s18, %s2076_s18 }
  0x61   :  { %p2083_p4 = por %p2082_p3, %p2081_p2 }
  0x63   :  { %p2084_p5 = pnand %p2083_p4, %p2077_p1 }
  0x65   :  { %2087 = shalt.err (!%p2084_p5)
}
  0x66   :  { %90 = dma.hbm_to_vmem [thread:$0]  %s2517_s10, 1024, %s2298_s27, [#allocation9], %s2144_s6, %s2144_s6, %s2145_s19  }
  0x67   :  { %s2150_s20 = smov [#allocation13]   ;;  %s2088_s17 = scalar_lea.hbm %s2520_s13, 1024 }
  0x68   :  { %s110_s22 = sshll.u32 %s2150_s20, 4  ;;  %p2089_p6 = scmp.ne.s32.totalorder %s2520_s13, %s2088_s17  ;;  %s111_s22 = int_to_ptr.vmem [resolvable:$true] %s110_s22 }
  0x69   :  { %p2092_p7 = scmp.lt.u32.totalorder %s2088_s17, %s2520_s13 }
  0x6b   :  { %p2094_p8 = pnand %p2092_p7, %p2089_p6 }
  0x6d   :  { %2097 = shalt.err (!%p2094_p8)
}
  0x6e   :  { %s2098_s26 = scalar_lea.vmem %s111_s22, 1024  ;;  %p2103_p10 = scmp.lt.s32.totalorder %s111_s22, %s111_s22 }
  0x6f   :  { %p2099_p9 = scmp.ne.s32.totalorder %s111_s22, %s2098_s26  ;;  %p2104_p11 = scmp.lt.s32.totalorder %s2098_s26, %s2098_s26 }
  0x71   :  { %p2105_p12 = por %p2104_p11, %p2103_p10 }
  0x73   :  { %p2106_p13 = pnand %p2105_p12, %p2099_p9 }
  0x75   :  { %2109 = shalt.err (!%p2106_p13)
}
  0x76   :  { %116 = dma.hbm_to_vmem [thread:$0]  %s2520_s13, 1024, %s111_s22, [#allocation12], %s2144_s6, %s2144_s6, %s2145_s19  }
  0x77   :  { %2132 = dma.done.wait [#allocation3], 16  }
  0x78   :  { %2133 = vsyncadd [#allocation3], 4294967280 }
  0x79   :  { %2134 = dma.done.wait [#allocation6], 80  }
  0x7a   :  { %2135 = vsyncadd [#allocation6], 4294967216 }
  0x7b   :  { %2136 = dma.done.wait [#allocation9], 2048  }
  0x7c   :  { %2137 = vsyncadd [#allocation9], 4294965248 }
  0x7d   :  { %2138 = dma.done.wait [#allocation12], 2048  }
  0x7e   :  { %2139 = vsyncadd [#allocation12], 4294965248  ;;  %v2151_v0 = vmov 0.0   ;;  %vm2152_vm0 = vmmov 0   ;;  %v2153_v1 = vmov 0   ;;  %vm153_vm1 = vcmask 1045504  }
  0x7f   :  { %1703 = vmatprep.subr.mxu0 %v2151_v0  ;;  %1705 = vmatprep.mubr.msk.f32.mxu0 %vm2152_vm0, %v2151_v0  ;;  %vm149_vm2 = vcmask 48128   ;;  %v141_v2 = vld [vmem:[%s2511_s4] sm:$0x3f]  ;;  %v325_v5 = vld [vmem:[%s2509_s2 + $0x10] sm:$0xff]  ;;  %v324_v6 = vld [vmem:[%s2509_s2 + $0x8] sm:$0xff]  ;;  %vm244_vm3 = vcmask 1042432   ;;  %v328_v14 = vlaneseq }
  0x80   :  { %1954 = vset.pattern.permute.xlu0 %v2153_v1  ;;  %1955 = vset.pattern.permute.xlu1 %v2153_v1  ;;  %v140_v3 = vld [vmem:[%s2507_s0] sm:$0xff]  ;;  %v326_v7 = vld [vmem:[%s2509_s2 + $0x18] sm:$0xff]  ;;  %vm237_vm4 = vcmask 23552   ;;  %v228_v10 = vld [vmem:[%s2508_s1 + $0x8] sm:$0xff]  ;;  %vm363_vm5 = vcmask 64512   ;;  %vm469_vm10 = vcmask 261120  }
  0x81   :  { %v323_v4 = vld [vmem:[%s2509_s2] sm:$0xff]  ;;  %1704 = vmatpush3.msk.msra.mxu0 %vm153_vm1, %v141_v2  ;;  %339 = vperm.xlu1 %1955, %v325_v5   ;;  %v465_v11 = vld [vmem:[#allocation8] sm:$0xff]  ;;  %v466_v12 = vld [vmem:[#allocation8 + $0x8] sm:$0xff]  ;;  %v329_v15 = vand.u32 127, %v328_v14  ;;  %v2154_v52 = vmov 0.0|0.0   ;;  %v331_v54 = vshrl.u32 %v328_v14, 7 }
  0x82   :  { %333 = vperm.xlu0 %1954, %v323_v4   ;;  %1706 = vmatmul.mubr.msk.f32.vlgmr.msra.gmra.mrb[0].mxu0 %vm149_vm2, %v140_v3  ;;  %v229_v8 = vld [vmem:[#allocation5] sm:$0x7]  ;;  %v1853_v13 = vpack.c.bf16 %v466_v12, %v465_v11  ;;  %v1577_v20 = vld [vmem:[#allocation2] ss:$0 sm:$0xff]  ;;  %v467_v28 = vld [vmem:[#allocation8 + $0x10] sm:$0xff]  ;;  %s2155_s19 = smov 96  }
  0x83   :  { %v227_v9 = vld [vmem:[%s2508_s1] sm:$0xff]  ;;  %1708 = vmatprep.subr.msk.mxu1 %vm244_vm3, %v229_v8  ;;  %v462_v32 = vld [vmem:[%s2515_s8 + $0x8] sm:$0xff]  ;;  %v463_v38 = vld [vmem:[%s2515_s8 + $0x10] sm:$0xff]  ;;  %vm728_vm12 = vcmask 130048   ;;  %s2156_s23 = smov [#allocation14]  }
  0x84   :  { %1710 = vmatprep.mubr.msk.f32.mxu1 %vm237_vm4, %v227_v9  ;;  %1709 = vmatpush3.msk.msra.mxu1 %vm244_vm3, %v229_v8  ;;  %v468_v29 = vld [vmem:[#allocation8 + $0x18] sm:$0xff]  ;;  %v464_v39 = vld [vmem:[%s2515_s8 + $0x18] sm:$0xff]  ;;  %v632_v43 = vld [vmem:[#allocation10] sm:$0xff]  ;;  %s1565_s5 = sshll.u32 %s2156_s23, 4  ;;  %s1566_s5 = int_to_ptr.vmem [resolvable:$true] %s1565_s5 }
  0x85   :  { %342 = vperm.xlu1 %1955, %v326_v7   ;;  %1711 = vmatmul.mubr.msk.f32.vlgmr.msra.gmra.mrb[0].mxu1 %vm237_vm4, %v228_v10  ;;  %v1857_v30 = vpack.c.bf16 %v468_v29, %v467_v28  ;;  %v461_v31 = vld [vmem:[%s2515_s8] sm:$0xff]  ;;  %v1865_v42 = vpack.c.bf16 %v464_v39, %v463_v38  ;;  %v633_v44 = vld [vmem:[#allocation10 + $0x8] sm:$0xff]  ;;  %v634_v47 = vld [vmem:[#allocation10 + $0x10] sm:$0xff]  ;;  %s2110_s1 = scalar_lea.vmem %s1566_s5, 128  ;;  %p2115_p1 = scmp.lt.s32.totalorder %s1566_s5, %s1566_s5 }
  0x86   :  { %336 = vperm.xlu0 %1954, %v324_v6   ;;  %1854 = vmatprep.subr.bf16.mxu1 %v1853_v13  ;;  %v1861_v33 = vpack.c.bf16 %v462_v32, %v461_v31  ;;  %v1869_v45 = vpack.c.bf16 %v633_v44, %v632_v43  ;;  %v1580_v46 = vld [vmem:[#allocation7] ss:$0 sm:$0xff]  ;;  %v1600_v53 = vld [vmem:[%s2518_s11] ss:$0 sm:$0xff]  ;;  %v806_v60 = vld [vmem:[#allocation13] sm:$0xff]  ;;  %p2111_p0 = scmp.ne.s32.totalorder %s1566_s5, %s2110_s1  ;;  %p2116_p2 = scmp.lt.s32.totalorder %s2110_s1, %s2110_s1 }
  0x87   :  { %1856 = vmatpush3.bf16.msra.mxu1 %v1853_v13  ;;  %v635_v48 = vld [vmem:[#allocation10 + $0x18] sm:$0xff]  ;;  %v807_v61 = vld [vmem:[#allocation13 + $0x8] sm:$0xff]  ;;  %v808_v2 = vld [vmem:[#allocation13 + $0x10] sm:$0xff] }
  0x88   :  { %1858 = vmatprep.subr.bf16.mxu1 %v1857_v30  ;;  %v1873_v50 = vpack.c.bf16 %v635_v48, %v634_v47  ;;  %v1588_v56 = vld [vmem:[%s2510_s3] ss:$0 sm:$0xff]  ;;  %v1881_v1 = vpack.c.bf16 %v807_v61, %v806_v60  ;;  %v802_v5 = vld [vmem:[#allocation11] sm:$0xff]  ;;  %v803_v6 = vld [vmem:[#allocation11 + $0x8] sm:$0xff]  ;;  %p2117_p3 = por %p2116_p2, %p2115_p1 }
  0x89   :  { %vm360_vm11 = vcmp.eq.s32.totalorder %v331_v54, %v1588_v56  ;;  %v809_v3 = vld [vmem:[#allocation13 + $0x18] sm:$0xff]  ;;  %v1887_v7 = vpack.c.bf16 %v803_v6, %v802_v5  ;;  %v804_v8 = vld [vmem:[#allocation11 + $0x10] sm:$0xff]  ;;  %v1055_v13 = vld [vmem:[#allocation8 + $0x20] sm:$0xff] }
  0x8a   :  { %v2426_v63 = vsel %vm360_vm11, 1.0, %v2151_v0  ;;  %v1884_v4 = vpack.c.bf16 %v809_v3, %v808_v2  ;;  %v805_v9 = vld [vmem:[#allocation11 + $0x18] sm:$0xff]  ;;  %v1056_v14 = vld [vmem:[#allocation8 + $0x28] sm:$0xff]  ;;  %v1610_v29 = vld [vmem:[%s2515_s8 + $0x28] sm:$0xff]  ;;  %p2118_p4 = pnand %p2117_p3, %p2111_p0 }
  0x8b   :  { %1860 = vmatpush3.bf16.msra.mxu1 %v1857_v30  ;;  %v1890_v12 = vpack.c.bf16 %v805_v9, %v804_v8  ;;  %v1611_v31 = vld [vmem:[%s2515_s8 + $0x30] sm:$0xff]  ;;  %v1612_v32 = vld [vmem:[%s2515_s8 + $0x38] sm:$0xff]  ;;  %v1620_v44 = vld [vmem:[%s2518_s11 + $0x1] ss:$0 sm:$0xff] }
  0x8c   :  { %1862 = vmatprep.subr.bf16.mxu1 %v1861_v33  ;;  %v1224_v39 = vld [vmem:[#allocation10 + $0x30] sm:$0xff]  ;;  %v1397_v61 = vld [vmem:[#allocation11 + $0x38] sm:$0xff] }
  0x8d   :  { %v1401_v54 = vld [vmem:[#allocation13 + $0x30] sm:$0xff]  ;;  %v1625_v5 = vld [vmem:[%s2521_s14 + $0x1] ss:$0 sm:$0xff] }
  0x8e   :  { %v1396_v60 = vld [vmem:[#allocation11 + $0x30] sm:$0xff] }
 0x100   :  { %v340_v18 = vpop.permute.xlu1 %339 }
 0x101   :  { %v334_v16 = vpop.permute.xlu0 %333  ;;  %vm346_vm7 = vcmp.eq.s32.totalorder %v329_v15, %v340_v18 }
 0x102   :  { %vm344_vm6 = vcmp.eq.s32.totalorder %v329_v15, %v334_v16  ;;  %v2380_v25 = vsel %vm346_vm7, 1.0, %v2151_v0 }
 0x103   :  { %v1584_v17 = vsel %vm344_vm6, 1.0, %v2151_v0 }
 0x104   :  { %1715 = vmatprep.mubr.msk.f32.mxu0 %vm363_vm5, %v1584_v17  ;;  %v343_v24 = vpop.permute.xlu1 %342 }
 0x105   :  { %v337_v19 = vpop.permute.xlu0 %336  ;;  %vm347_vm9 = vcmp.eq.s32.totalorder %v329_v15, %v343_v24  ;;  %v1058_v24 = vld [vmem:[#allocation8 + $0x38] sm:$0xff] }
 0x106   :  { %vm345_vm8 = vcmp.eq.s32.totalorder %v329_v15, %v337_v19  ;;  %v2392_v27 = vsel %vm347_vm9, 1.0, %v2151_v0  ;;  %v1892_v15 = vpack.c.bf16 %v1056_v14, %v1055_v13  ;;  %v1604_v19 = vld [vmem:[%s2521_s14] ss:$0 sm:$0xff] }
 0x107   :  { %v2384_v26 = vsel %vm345_vm8, 1.0, %v2151_v0 }
 0x155   :  { %v223_v21 = vpop.f32.mrb[0].mxu0 }
 0x156   :  { %v2377_v22 = vadd.f32 %v1577_v20, %v223_v21  ;;  %v1707_v23 = vpop.f32.mrb[1].mxu0 }
 0x158   :  { %1713 = vmatprep.subr.mxu0 %v2377_v22  ;;  %v1712_v34 = vpop.f32.mrb[0].mxu1 }
 0x159   :  { %1714 = vmatpush3.msra.mxu0 %v2377_v22  ;;  %v314_v35 = vpop.f32.mrb[1].mxu1  ;;  %v320_v51 = vadd.f32 %v1712_v34, %v1580_v46 }
 0x15a   :  { %1716 = vmatmul.mubr.msk.f32.vlgmr.msra.gmra.mrb[2].mxu0 %vm363_vm5, %v2384_v26  ;;  %v315_v49 = vadd.f32 %v1580_v46, %v314_v35  ;;  %1877 = vmatprep.subr.bf16.mxu0 %v2154_v52  ;;  %v1904_v35 = vpack.c.bf16 %v1612_v32, %v1611_v31 }
 0x15b   :  { %1718 = vmatprep.mubr.msk.f32.mxu0 %vm363_vm5, %v2380_v25 }
 0x15e   :  { %1719 = vmatmul.mubr.msk.f32.gmra.mrb[4].mxu0 %vm363_vm5, %v2392_v27 }
 0x15f   :  { %1758 = vmatprep.mubr.msk.f32.mxu0 %vm2152_vm0, %v2151_v0 }
 0x22d   :  { %v1717_v36 = vpop.f32.mrb[2].mxu0 }
 0x22e   :  { %v442_v37 = vpop.f32.mrb[3].mxu0 }
 0x231   :  { %v1720_v40 = vpop.f32.mrb[4].mxu0 }
 0x232   :  { %v452_v41 = vpop.f32.mrb[5].mxu0 }
 0x233   :  { %1729 = vmatprep.mubr.msk.f32.mxu1 %vm469_vm10, %v452_v41 }
 0x234   :  { %1730 = vmatmul.mubr.msk.f32.vlgmr.msra.gmra.mrb[2].mxu1 %vm469_vm10, %v1720_v40  ;;  %v1225_v40 = vld [vmem:[#allocation10 + $0x38] sm:$0xff] }
 0x235   :  { %1864 = vmatpush3.bf16.msra.mxu1 %v1861_v33  ;;  %1740 = vmatprep.mubr.msk.f32.mxu1 %vm469_vm10, %v442_v37  ;;  %v1223_v37 = vld [vmem:[#allocation10 + $0x28] sm:$0xff]  ;;  %v1912_v41 = vpack.c.bf16 %v1225_v40, %v1224_v39 }
 0x236   :  { %1866 = vmatprep.subr.bf16.mxu1 %v1865_v42 }
 0x239   :  { %1868 = vmatpush3.bf16.msra.mxu1 %v1865_v42 }
 0x23a   :  { %1870 = vmatprep.subr.bf16.mxu1 %v1869_v45 }
 0x23c   :  { %1741 = vmatmul.mubr.msk.f32.vlgmr.msra.gmra.mrb[2].mxu1 %vm469_vm10, %v1717_v36  ;;  %v1222_v36 = vld [vmem:[#allocation10 + $0x20] sm:$0xff] }
 0x23d   :  { %1872 = vmatpush3.bf16.msra.mxu1 %v1869_v45  ;;  %1751 = vmatprep.mubr.msk.f32.mxu1 %vm469_vm10, %v315_v49  ;;  %v1908_v38 = vpack.c.bf16 %v1223_v37, %v1222_v36  ;;  %v1399_v49 = vld [vmem:[#allocation13 + $0x20] sm:$0xff] }
 0x23e   :  { %1874 = vmatprep.subr.bf16.mxu1 %v1873_v50 }
 0x241   :  { %1876 = vmatpush3.bf16.msra.mxu1 %v1873_v50  ;;  %v1400_v50 = vld [vmem:[#allocation13 + $0x28] sm:$0xff] }
 0x244   :  { %1752 = vmatmul.mubr.msk.f32.vlgmr.msra.gmra.mrb[2].mxu1 %vm469_vm10, %v320_v51 }
 0x245   :  { %1785 = vmatprep.mubr.msk.f32.mxu1 %vm363_vm5, %v1584_v17 }
 0x317   :  { %v1753_v55 = vpop.f32.mrb[2].mxu1 }
 0x318   :  { %v727_v57 = vadd.f32 %v1753_v55, %v1600_v53  ;;  %v708_v58 = vpop.f32.mrb[3].mxu1  ;;  %v1402_v55 = vld [vmem:[#allocation13 + $0x38] sm:$0xff] }
 0x319   :  { %v726_v59 = vadd.f32 %v1600_v53, %v708_v58  ;;  %v1920_v53 = vpack.c.bf16 %v1400_v50, %v1399_v49  ;;  %v1923_v56 = vpack.c.bf16 %v1402_v55, %v1401_v54  ;;  %v1395_v58 = vld [vmem:[#allocation11 + $0x28] sm:$0xff] }
 0x31a   :  { %1230 = vrot.lane.b32.xlu1 %v727_v57, %s2155_s19 }
 0x31b   :  { %v1878_v62 = vpack.c.bf16 %v727_v57, %v726_v59  ;;  %1228 = vrot.lane.b32.xlu0 %v726_v59, %s2155_s19  ;;  %v1394_v57 = vld [vmem:[#allocation11 + $0x20] sm:$0xff] }
 0x31c   :  { %v1926_v59 = vpack.c.bf16 %v1395_v58, %v1394_v57 }
 0x31d   :  { %1879 = vmatpush3.bf16.msra.mxu0 %v1878_v62 }
 0x31e   :  { %1880 = vmatprep.subr.bf16.mxu0 %v2154_v52 }
 0x320   :  { %1759 = vmatmul.mubr.msk.f32.vlgmr.msra.gmra.mrb[6].mxu0 %vm728_vm12, %v2426_v63 }
 0x321   :  { %1882 = vmatpush3.bf16.msra.mxu0 %v1881_v1  ;;  %1769 = vmatprep.mubr.msk.f32.mxu0 %vm2152_vm0, %v2151_v0 }
 0x322   :  { %1883 = vmatprep.subr.bf16.mxu0 %v2154_v52 }
 0x325   :  { %1885 = vmatpush3.bf16.msra.mxu0 %v1884_v4 }
 0x326   :  { %1886 = vmatprep.subr.bf16.mxu0 %v2154_v52 }
 0x38c   :  { %v1231_v43 = vpop.permute.xlu1 %1230 }
 0x38d   :  { %v1229_v42 = vpop.permute.xlu0 %1228 }
 0x3f3   :  { %v798_v10 = vpop.f32.mrb[6].mxu0 }
 0x3f4   :  { %v1760_v11 = vpop.f32.mrb[7].mxu0  ;;  %1770 = vmatmul.mubr.msk.f32.vlgmr.msra.gmra.mrb[8].mxu0 %vm469_vm10, %v798_v10 }
 0x3f5   :  { %1888 = vmatpush3.bf16.msra.mxu0 %v1887_v7  ;;  %1780 = vmatprep.mubr.msk.f32.mxu0 %vm2152_vm0, %v2151_v0 }
 0x3f6   :  { %1889 = vmatprep.subr.bf16.mxu0 %v2154_v52 }
 0x3f9   :  { %1891 = vmatpush3.bf16.msra.mxu0 %v1890_v12 }
 0x3fa   :  { %1893 = vmatprep.subr.bf16.mxu0 %v1892_v15 }
 0x3fc   :  { %1781 = vmatmul.mubr.msk.f32.vlgmr.msra.gmra.mrb[10].mxu0 %vm469_vm10, %v2377_v22  ;;  %v1057_v22 = vld [vmem:[#allocation8 + $0x30] sm:$0xff] }
 0x3fd   :  { %1895 = vmatpush3.bf16.msra.mxu0 %v1892_v15  ;;  %v1896_v28 = vpack.c.bf16 %v1058_v24, %v1057_v22 }
 0x3ff   :  { %1897 = vmatprep.subr.bf16.mxu0 %v1896_v28 }
 0x401   :  { %1899 = vmatpush3.bf16.msra.mxu0 %v1896_v28 }
 0x4c7   :  { %v879_v16 = vpop.f32.mrb[8].mxu0 }
 0x4c8   :  { %v1771_v17 = vpop.f32.mrb[9].mxu0 }
 0x4cf   :  { %v952_v18 = vpop.f32.mrb[10].mxu0 }
 0x4d0   :  { %v953_v20 = vadd.f32 %v952_v18, %v879_v16  ;;  %v1782_v21 = vpop.f32.mrb[11].mxu0 }
 0x4d2   :  { %v2444_v23 = vadd.f32 %v1604_v19, %v953_v20 }
 0x4d4   :  { %1783 = vmatprep.subr.mxu1 %v2444_v23 }
 0x4d5   :  { %1784 = vmatpush3.msra.mxu1 %v2444_v23 }
 0x4d6   :  { %1786 = vmatmul.mubr.msk.f32.vlgmr.msra.gmra.mrb[4].mxu1 %vm363_vm5, %v2384_v26  ;;  %1916 = vmatprep.subr.bf16.mxu1 %v2154_v52  ;;  %v1609_v26 = vld [vmem:[%s2515_s8 + $0x20] sm:$0xff] }
 0x4d7   :  { %1788 = vmatprep.mubr.msk.f32.mxu1 %vm363_vm5, %v2380_v25  ;;  %v1900_v25 = vpack.c.bf16 %v1610_v29, %v1609_v26 }
 0x4d9   :  { %1901 = vmatprep.subr.bf16.mxu0 %v1900_v25 }
 0x4da   :  { %1789 = vmatmul.mubr.msk.f32.gmra.mrb[6].mxu1 %vm363_vm5, %v2392_v27 }
 0x4db   :  { %1828 = vmatprep.mubr.msk.f32.mxu1 %vm2152_vm0, %v2151_v0 }
 0x5a9   :  { %v1787_v30 = vpop.f32.mrb[4].mxu1 }
 0x5aa   :  { %v1030_v27 = vpop.f32.mrb[5].mxu1 }
 0x5ad   :  { %v1790_v33 = vpop.f32.mrb[6].mxu1 }
 0x5ae   :  { %v1040_v34 = vpop.f32.mrb[7].mxu1 }
 0x5af   :  { %1799 = vmatprep.mubr.msk.f32.mxu0 %vm469_vm10, %v1040_v34 }
 0x5b0   :  { %1800 = vmatmul.mubr.msk.f32.vlgmr.msra.gmra.mrb[12].mxu0 %vm469_vm10, %v1790_v33 }
 0x5b1   :  { %1903 = vmatpush3.bf16.msra.mxu0 %v1900_v25  ;;  %1810 = vmatprep.mubr.msk.f32.mxu0 %vm469_vm10, %v1030_v27 }
 0x5b2   :  { %1905 = vmatprep.subr.bf16.mxu0 %v1904_v35 }
 0x5b5   :  { %1907 = vmatpush3.bf16.msra.mxu0 %v1904_v35 }
 0x5b6   :  { %1909 = vmatprep.subr.bf16.mxu0 %v1908_v38 }
 0x5b8   :  { %1811 = vmatmul.mubr.msk.f32.vlgmr.msra.gmra.mrb[12].mxu0 %vm469_vm10, %v1787_v30 }
 0x5b9   :  { %1911 = vmatpush3.bf16.msra.mxu0 %v1908_v38  ;;  %1821 = vmatprep.mubr.msk.f32.mxu0 %vm469_vm10, %v1229_v42 }
 0x5ba   :  { %1913 = vmatprep.subr.bf16.mxu0 %v1912_v41 }
 0x5bd   :  { %1915 = vmatpush3.bf16.msra.mxu0 %v1912_v41 }
 0x5c0   :  { %1822 = vmatmul.mubr.msk.f32.vlgmr.msra.gmra.mrb[12].mxu0 %vm469_vm10, %v1231_v43 }
 0x693   :  { %v1823_v45 = vpop.f32.mrb[12].mxu0 }
 0x694   :  { %v1322_v46 = vadd.f32 %v1823_v45, %v1620_v44  ;;  %v1302_v47 = vpop.f32.mrb[13].mxu0 }
 0x695   :  { %v1321_v48 = vadd.f32 %v1620_v44, %v1302_v47 }
 0x697   :  { %v1917_v51 = vpack.c.bf16 %v1322_v46, %v1321_v48 }
 0x699   :  { %1918 = vmatpush3.bf16.msra.mxu1 %v1917_v51 }
 0x69a   :  { %1919 = vmatprep.subr.bf16.mxu1 %v2154_v52 }
 0x69c   :  { %1829 = vmatmul.mubr.msk.f32.vlgmr.msra.gmra.mrb[8].mxu1 %vm728_vm12, %v2426_v63  ;;  %v1929_v63 = vpack.c.bf16 %v1397_v61, %v1396_v60 }
 0x69d   :  { %1921 = vmatpush3.bf16.msra.mxu1 %v1920_v53  ;;  %1839 = vmatprep.mubr.msk.f32.mxu1 %vm2152_vm0, %v2151_v0 }
 0x69e   :  { %1922 = vmatprep.subr.bf16.mxu1 %v2154_v52 }
 0x6a1   :  { %1924 = vmatpush3.bf16.msra.mxu1 %v1923_v56 }
 0x6a2   :  { %1925 = vmatprep.subr.bf16.mxu1 %v2154_v52 }
 0x76f   :  { %v1389_v62 = vpop.f32.mrb[8].mxu1 }
 0x770   :  { %1840 = vmatmul.mubr.msk.f32.vlgmr.msra.gmra.mrb[10].mxu1 %vm469_vm10, %v1389_v62  ;;  %v1830_v1 = vpop.f32.mrb[9].mxu1 }
 0x771   :  { %1927 = vmatpush3.bf16.msra.mxu1 %v1926_v59  ;;  %1850 = vmatprep.mubr.msk.f32.mxu1 %vm2152_vm0, %v2151_v0 }
 0x772   :  { %1928 = vmatprep.subr.bf16.mxu1 %v2154_v52 }
 0x775   :  { %1930 = vmatpush3.bf16.msra.mxu1 %v1929_v63 }
 0x778   :  { %1851 = vmatmul.mubr.msk.f32.vlgmr.msra.gmra.mrb[12].mxu1 %vm469_vm10, %v2444_v23 }
 0x843   :  { %v1472_v2 = vpop.f32.mrb[10].mxu1 }
 0x844   :  { %v1841_v3 = vpop.f32.mrb[11].mxu1 }
 0x84b   :  { %v1545_v4 = vpop.f32.mrb[12].mxu1 }
 0x84c   :  { %v1546_v6 = vadd.f32 %v1545_v4, %v1472_v2  ;;  %v1852_v7 = vpop.f32.mrb[13].mxu1 }
 0x84e   :  { %v1557_v8 = vadd.f32 %v1625_v5, %v1546_v6 }
 0x850   :  { %1558 = vst.msk [vmem:[#allocation14] sm:$0xff] %vm469_vm10, %v1557_v8 }
 0x851   :  { %2121 = shalt.err (!%p2118_p4)
}
 0x852   :  { %s2122_s24 = scalar_lea.hbm %s2522_s15, 128 }
 0x853   :  { %p2123_p5 = scmp.ne.s32.totalorder %s2522_s15, %s2122_s24  ;;  %p2126_p6 = scmp.lt.u32.totalorder %s2122_s24, %s2522_s15 }
 0x855   :  { %p2128_p7 = pnand %p2126_p6, %p2123_p5 }
 0x857   :  { %2131 = shalt.err (!%p2128_p7)
}
 0x858   :  { %1568 = dma.vmem_to_hbm [thread:$0]  %s1566_s5, 128, %s2522_s15, [#allocation4]  }
 0x859   :  { %2140 = dma.done.wait [#allocation4], 128  }
 0x85a   :  { %2141 = vsyncadd [#allocation4], 4294967168 }
 0x85b   :  { %1572 = vsyncpa [#allocation3], 1 }
 0x85c   :  { %1573 = vsyncpa [#allocation6], 1 }
 0x85d   :  { %1574 = vsyncpa [#allocation9], 1 }
 0x85e   :  { %1575 = vsyncpa [#allocation12], 1 }
 0x85f   :  { %1576 = vsyncpa [#allocation4], 1 }

</bundles_post_ra>
